<compile_context>
chip_gen: v6e
topology: v6e:2x2x1
jax: 0.10.0
libtpu: 0.0.40
codegen_flags: <defaults>
</compile_context>

<pallas_src>
import jax
import jax.numpy as jnp
from jax.experimental import pallas as pl
from jax.experimental.pallas import tpu as pltpu


# ---------------------------------------------------------------------------
# Hardware-aware sizing helpers.
# ---------------------------------------------------------------------------

_FALLBACK_VMEM_CAPACITY = 64 * 1024 * 1024   # safe lower bound across v5e/v6e/v7x


def _vmem_capacity_bytes():
    """Physical VMEM capacity of the local TPU (conservative fallback)."""
    try:
        return int(pltpu.get_tpu_info().vmem_capacity_bytes)
    except Exception:
        return _FALLBACK_VMEM_CAPACITY


def _tensorcores_per_chip():
    """2 for v7x-class chips (two TCs per chip), 1 for v5e/v6e/v4/etc."""
    try:
        kind = jax.devices()[0].device_kind.lower()
    except Exception:
        return 1
    return 2 if "7" in kind else 1


def _padded_2d_bytes(rows, cols, dtype):
    """VMEM footprint of a [rows, cols] tile after (sublane, lane) padding."""
    itemsize = jnp.dtype(dtype).itemsize
    sub = 8 * max(1, 4 // itemsize)          # 8 (f32) / 16 (bf16) / 32 (int8)
    r = -(-rows // sub) * sub
    c = -(-cols // 128) * 128
    return r * c * itemsize


def _plan_blocks(n, c, cr, hw, x_dtype, block_budget, multi_core):
    """Choose images-per-step.  Returns (nb, grid_len, single_buffer)."""
    slab = _padded_2d_bytes(c, hw, x_dtype)              # one VMEM copy of one image
    w_bytes = (_padded_2d_bytes(c, cr, jnp.float32) +
               _padded_2d_bytes(cr, c, jnp.float32))     # single-buffered weights
    avail = block_budget - w_bytes
    if avail <= 0:
        raise NotImplementedError(
            "TODO(synk): VMEM block budget too small even for the SE weights.")

    # On 2-TC chips keep >= 2 grid steps so both cores get work.
    want_two_steps = multi_core and n >= 2

    # Whole batch in one single-buffered step: nothing to overlap, so do not
    # pay the double-buffered VMEM tax.
    if not want_two_steps and avail >= 2 * n * slab:
        return n, 1, True

    # Default: double-buffered in + out blocks (4 slab copies per image in flight).
    nb = avail // (4 * slab)
    if want_two_steps:
        nb = min(nb, -(-n // 2))             # ceil(n/2) -> exactly 2 grid steps
    nb = min(nb, n)
    if nb >= 1:
        nb = int(nb)
        return nb, (n + nb - 1) // nb, False

    # Last resort: one image per step, single-buffered (serial, but it fits).
    if avail >= 2 * slab:
        return 1, n, True

    raise NotImplementedError(
        "TODO(synk): single-image C*H*W slab exceeds the VMEM block budget; "
        "needs an inner pltpu.emit_pipeline over H*W chunks from a "
        "memory_space=pl.ANY x ref.")


# ---------------------------------------------------------------------------
# Kernel.
# ---------------------------------------------------------------------------

def _se_kernel(x_ref, w1_ref, w2_ref, o_ref):
    # x_ref:  (Nb, C, HW)  block of input images
    # w1_ref: (C, Cr)      fc1 weight, [Cin, Cout], f32
    # w2_ref: (Cr, C)      fc2 weight, [Cin, Cout], f32
    hw = x_ref.shape[-1]
    inv_hw = jnp.float32(1.0 / hw)

    # AdaptiveAvgPool2d(1): spatial mean with f32 accumulation (read #1 of x;
    # the cast fuses into the reduction, no live f32 slab).
    pooled = jnp.sum(x_ref[...], axis=-1, dtype=jnp.float32) * inv_hw      # (Nb, C)

    # fc1 (1x1 conv, no bias) + ReLU.
    h1 = jnp.maximum(
        jnp.dot(pooled, w1_ref[...], preferred_element_type=jnp.float32), 0.0)

    # fc2 (1x1 conv, no bias) + Sigmoid -> per-(n, c) gate.
    s = jax.nn.sigmoid(
        jnp.dot(h1, w2_ref[...], preferred_element_type=jnp.float32))      # (Nb, C)

    # Scale pass (read #2 of x): multiply in the input dtype (bf16 VALU on
    # v6e/v7x), broadcasting the gate over the spatial (lane) axis.
    o_ref[...] = x_ref[...] * s.astype(o_ref.dtype)[:, :, None]


# ---------------------------------------------------------------------------
# Wrapper.
# ---------------------------------------------------------------------------

def se_module(x, w_fc1, w_fc2, *, block_budget_bytes=None, vmem_limit_bytes=None):
    """SEModule forward.

    Args:
      x:     [N, C, H, W] input (NCHW, matching PyTorch).
      w_fc1: [C//r, C, 1, 1] fc1 conv weight (PyTorch layout).
      w_fc2: [C, C//r, 1, 1] fc2 conv weight (PyTorch layout).
      block_budget_bytes / vmem_limit_bytes: optional overrides (testing/tuning).
    Returns:
      [N, C, H, W] output, same dtype as x.
    """
    n, c, h, w = x.shape
    cr = w_fc1.shape[0]
    hw = h * w
    itemsize = jnp.dtype(x.dtype).itemsize

    x_flat = x.reshape(n, c, hw)
    # Pre-transpose to [Cin, Cout] and pre-cast to f32 once (grid-invariant).
    w1_t = w_fc1.reshape(cr, c).T.astype(jnp.float32)   # (C, Cr)
    w2_t = w_fc2.reshape(c, cr).T.astype(jnp.float32)   # (Cr, C)

    # Generation-aware VMEM sizing: limit ~0.8x physical, block budget ~0.8x
    # the limit (~102/82 MiB on 128-MiB v5e/v6e, ~51/41 MiB on 64-MiB v7x).
    if vmem_limit_bytes is None:
        vmem_limit_bytes = int(_vmem_capacity_bytes() * 0.80)
    if block_budget_bytes is None:
        block_budget_bytes = int(vmem_limit_bytes * 0.80)
    block_budget_bytes = min(int(block_budget_bytes), int(vmem_limit_bytes))

    multi_core = _tensorcores_per_chip() > 1
    nb, grid_len, single_buffer = _plan_blocks(
        n, c, cr, hw, x.dtype, block_budget_bytes, multi_core)

    # Single-buffer the big x / out blocks when there is nothing to pipeline
    # (grid of 1 or last-resort fit); otherwise keep default double-buffering.
    if single_buffer:
        x_spec = pl.BlockSpec((nb, c, hw), lambda i: (i, 0, 0),
                              pipeline_mode=pl.Buffered(1))
        o_spec = pl.BlockSpec((nb, c, hw), lambda i: (i, 0, 0),
                              pipeline_mode=pl.Buffered(1))
    else:
        x_spec = pl.BlockSpec((nb, c, hw), lambda i: (i, 0, 0))
        o_spec = pl.BlockSpec((nb, c, hw), lambda i: (i, 0, 0))

    # On v7x actually split the batch axis across both TensorCores.
    if multi_core and grid_len >= 2:
        dim_sem = (getattr(pltpu, "CORE_PARALLEL", "parallel"),)
    else:
        dim_sem = ("parallel",)

    cost = pl.CostEstimate(
        # spatial mean + broadcast scale + the two tiny gate matmuls
        flops=int(n * (3 * c * hw + 4 * c * cr)),
        transcendentals=int(n * c),                      # sigmoid
        bytes_accessed=int(2 * n * c * hw * itemsize     # x in + out
                           + 4 * 2 * c * cr),            # weights (f32)
    )

    out_flat = pl.pallas_call(
        _se_kernel,
        out_shape=jax.ShapeDtypeStruct((n, c, hw), x.dtype),
        grid_spec=pltpu.PrefetchScalarGridSpec(
            num_scalar_prefetch=0,
            grid=(grid_len,),
            in_specs=[
                x_spec,
                # Weights never change across the grid: single-buffer them.
                pl.BlockSpec((c, cr), lambda i: (0, 0),
                             pipeline_mode=pl.Buffered(1)),
                pl.BlockSpec((cr, c), lambda i: (0, 0),
                             pipeline_mode=pl.Buffered(1)),
            ],
            out_specs=o_spec,
        ),
        compiler_params=pltpu.CompilerParams(
            dimension_semantics=dim_sem,
            vmem_limit_bytes=int(vmem_limit_bytes)),
        cost_estimate=cost,
    )(x_flat, w1_t, w2_t)

    return out_flat.reshape(n, c, h, w)


# ---------------------------------------------------------------------------
# Pure-JAX reference + self-test.
# ---------------------------------------------------------------------------

def se_module_ref(x, w_fc1, w_fc2):
    """Pure-JAX reference mirroring the PyTorch module."""
    n, c, h, w = x.shape
    cr = w_fc1.shape[0]
    pooled = jnp.mean(x.astype(jnp.float32), axis=(2, 3))        # (N, C)
    h1 = jnp.maximum(pooled @ w_fc1.reshape(cr, c).T, 0.0)       # (N, Cr)
    s = jax.nn.sigmoid(h1 @ w_fc2.reshape(c, cr).T)              # (N, C)
    return (x.astype(jnp.float32) * s[:, :, None, None]).astype(x.dtype)


def _run_case(key, n, c, h, w, red, **kw):
    cr = c // red
    kx, k1, k2 = jax.random.split(key, 3)
    x = jax.random.normal(kx, (n, c, h, w), dtype=jnp.float32)
    # Deterministic synthetic weights (kaiming-ish scale), PyTorch conv layout.
    w_fc1 = jax.random.normal(k1, (cr, c, 1, 1), dtype=jnp.float32) * (2.0 / c) ** 0.5
    w_fc2 = jax.random.normal(k2, (c, cr, 1, 1), dtype=jnp.float32) * (2.0 / cr) ** 0.5

    out = jax.block_until_ready(se_module(x, w_fc1, w_fc2, **kw))
    ref = jax.block_until_ready(se_module_ref(x, w_fc1, w_fc2))

    assert out.shape == (n, c, h, w)
    assert jnp.allclose(out, ref, atol=1e-5, rtol=1e-5), \
        float(jnp.max(jnp.abs(out - ref)))


if __name__ == "__main__":
    key = jax.random.PRNGKey(0)
    k_a, k_b, k_c = jax.random.split(key, 3)

    # SEModule(channels=4, reduction=2): whole batch, one single-buffered step.
    _run_case(k_a, n=2, c=4, h=16, w=16, red=2)
    # Larger channels, Nb > 1 images in one block.
    _run_case(k_b, n=4, c=32, h=8, w=8, red=4)
    # Force a multi-step, ragged (cdiv) grid with a tiny block budget:
    # nb=2 images/step over n=5 -> 3 grid steps, last one partial.
    _run_case(k_c, n=5, c=8, h=16, w=16, red=2,
              block_budget_bytes=80 * 1024)

    print("KERNEL_OK")
</pallas_src>

<mosaic_0001>
module attributes {stable_mosaic.version = 11 : i64} {
  func.func @_se_kernel(%arg0: i32, %arg1: memref<2x4x256xf32, #tpu.memory_space<vmem>>, %arg2: memref<4x2xf32, #tpu.memory_space<vmem>>, %arg3: memref<2x4xf32, #tpu.memory_space<vmem>>, %arg4: memref<2x4x256xf32, #tpu.memory_space<vmem>>) attributes {dimension_semantics = [#tpu.dimension_semantics<parallel>], iteration_bounds = array<i64: 1>, scalar_prefetch = 0 : i64, scratch_operands = 0 : i64, tpu.core_type = #tpu.core_type<tc>, window_params = [{pipeline_mode = #tpu.pipeline_mode<synchronous>, transform_indices = @transform_0, window_bounds = array<i64: 2, 4, 256>}, {pipeline_mode = #tpu.pipeline_mode<synchronous>, transform_indices = @transform_1, window_bounds = array<i64: 4, 2>}, {pipeline_mode = #tpu.pipeline_mode<synchronous>, transform_indices = @transform_2, window_bounds = array<i64: 2, 4>}, {pipeline_mode = #tpu.pipeline_mode<synchronous>, transform_indices = @transform_3, window_bounds = array<i64: 2, 4, 256>}]} {
    %c0 = arith.constant 0 : index
    %c0_0 = arith.constant 0 : index
    %c0_1 = arith.constant 0 : index
    %0 = vector.load %arg1[%c0, %c0_0, %c0_1] : memref<2x4x256xf32, #tpu.memory_space<vmem>>, vector<2x4x256xf32>
    %cst = arith.constant dense<0.000000e+00> : vector<2x4xf32>
    %1 = vector.multi_reduction <add>, %0, %cst [2] : vector<2x4x256xf32> to vector<2x4xf32>
    %cst_2 = arith.constant 3.906250e-03 : f32
    %2 = vector.broadcast %cst_2 : f32 to vector<2x4xf32>
    %3 = arith.mulf %1, %2 : vector<2x4xf32>
    %c0_3 = arith.constant 0 : index
    %c0_4 = arith.constant 0 : index
    %4 = vector.load %arg2[%c0_3, %c0_4] : memref<4x2xf32, #tpu.memory_space<vmem>>, vector<4x2xf32>
    %cst_5 = arith.constant dense<0.000000e+00> : vector<2x2xf32>
    %5 = tpu.matmul %3, %4, %cst_5 {dimension_numbers = #tpu.dot_dimension_numbers<[1], [0], [0], [1], [0, 0, 1, 1], [], []>} : vector<2x4xf32>, vector<4x2xf32>, vector<2x2xf32> -> vector<2x2xf32>
    %cst_6 = arith.constant 0.000000e+00 : f32
    %6 = vector.broadcast %cst_6 : f32 to vector<2x2xf32>
    %7 = arith.maximumf %5, %6 : vector<2x2xf32>
    %c0_7 = arith.constant 0 : index
    %c0_8 = arith.constant 0 : index
    %8 = vector.load %arg3[%c0_7, %c0_8] : memref<2x4xf32, #tpu.memory_space<vmem>>, vector<2x4xf32>
    %cst_9 = arith.constant dense<0.000000e+00> : vector<2x4xf32>
    %9 = tpu.matmul %7, %8, %cst_9 {dimension_numbers = #tpu.dot_dimension_numbers<[1], [0], [0], [1], [0, 0, 1, 1], [], []>} : vector<2x2xf32>, vector<2x4xf32>, vector<2x4xf32> -> vector<2x4xf32>
    %10 = arith.negf %9 : vector<2x4xf32>
    %11 = math.exp %10 : vector<2x4xf32>
    %cst_10 = arith.constant 1.000000e+00 : f32
    %12 = vector.broadcast %cst_10 : f32 to vector<2x4xf32>
    %13 = arith.addf %12, %11 : vector<2x4xf32>
    %14 = arith.divf %12, %13 : vector<2x4xf32>
    %c0_11 = arith.constant 0 : index
    %c0_12 = arith.constant 0 : index
    %c0_13 = arith.constant 0 : index
    %15 = vector.load %arg1[%c0_11, %c0_12, %c0_13] : memref<2x4x256xf32, #tpu.memory_space<vmem>>, vector<2x4x256xf32>
    %16 = vector.shape_cast %14 : vector<2x4xf32> to vector<2x4x1xf32>
    %17 = vector.broadcast %16 : vector<2x4x1xf32> to vector<2x4x256xf32>
    %18 = arith.mulf %15, %17 : vector<2x4x256xf32>
    %c0_14 = arith.constant 0 : index
    %c0_15 = arith.constant 0 : index
    %c0_16 = arith.constant 0 : index
    %19 = vector.load %arg4[%c0_14, %c0_15, %c0_16] : memref<2x4x256xf32, #tpu.memory_space<vmem>>, vector<2x4x256xf32>
    tpu.vector_store %arg4[%c0_14, %c0_15, %c0_16], %18 {strides = array<i32>} : memref<2x4x256xf32, #tpu.memory_space<vmem>>, vector<2x4x256xf32>,
    return
  }
  func.func @transform_0(%arg0: i32) -> (i32, i32, i32) {
    %c0_i32 = arith.constant 0 : i32
    %c0_i32_0 = arith.constant 0 : i32
    %c0_i32_1 = arith.constant 0 : i32
    return %arg0, %c0_i32, %c0_i32_0 : i32, i32, i32
  }
  func.func @transform_1(%arg0: i32) -> (i32, i32) {
    %c0_i32 = arith.constant 0 : i32
    %c0_i32_0 = arith.constant 0 : i32
    %c0_i32_1 = arith.constant 0 : i32
    return %c0_i32, %c0_i32_0 : i32, i32
  }
  func.func @transform_2(%arg0: i32) -> (i32, i32) {
    %c0_i32 = arith.constant 0 : i32
    %c0_i32_0 = arith.constant 0 : i32
    %c0_i32_1 = arith.constant 0 : i32
    return %c0_i32, %c0_i32_0 : i32, i32
  }
  func.func @transform_3(%arg0: i32) -> (i32, i32, i32) {
    %c0_i32 = arith.constant 0 : i32
    %c0_i32_0 = arith.constant 0 : i32
    %c0_i32_1 = arith.constant 0 : i32
    return %arg0, %c0_i32, %c0_i32_0 : i32, i32, i32
  }
}

</mosaic_0001>

<bundles_post_ra>
// kernel: tpu_custom_call.1
= control target key start
LH: loop header
LB: loop body
LE: loop exit
PB: predicated region body
PF: predicated region fallthrough
CT: control target
= control target key end

     0   :  { %8 = vsyncpa [#allocation3], 0  ;;  %s412_s0 = inlined_call_operand.hbm [shape: f32[2,4,256], index: 0, kind: input, shape index: {}]   ;;  %s413_s1 = inlined_call_operand.vmem [shape: f32[4,2], index: 1, kind: input, shape index: {}]   ;;  %s414_s2 = inlined_call_operand.vmem [shape: f32[2,4], index: 2, kind: input, shape index: {}]   ;;  %s415_s3 = inlined_call_operand.hbm [shape: f32[2,4,256], index: 3, kind: output, shape index: {}]  }
   0x1   :  { %9 = vsyncpa [#allocation4], 0  ;;  %s356_s12 = smov [#allocation2]  }
   0x2   :  { %s15_s13 = sshll.u32 %s356_s12, 4  ;;  %s16_s13 = int_to_ptr.vmem [resolvable:$true] %s15_s13 }
   0x3   :  { %s320_s14 = scalar_lea.vmem %s16_s13, 256  ;;  %p325_p1 = scmp.lt.s32.totalorder %s16_s13, %s16_s13 }
   0x4   :  { %p321_p0 = scmp.ne.s32.totalorder %s16_s13, %s320_s14  ;;  %p326_p2 = scmp.lt.s32.totalorder %s320_s14, %s320_s14 }
   0x6   :  { %p327_p3 = por %p326_p2, %p325_p1 }
   0x8   :  { %p328_p4 = pnand %p327_p3, %p321_p0 }
   0xa   :  { %331 = shalt.err (!%p328_p4)
}
   0xb   :  { %s357_s15 = smov 128   ;;  %s358_s16 = smov 8  }
   0xc   :  { %21 = dma.hbm_to_vmem [thread:$0]  %s412_s0, 256, %s16_s13, [#allocation3], %s357_s15, %s357_s15, %s358_s16  }
   0xd   :  { %352 = dma.done.wait [#allocation3], 256  }
   0xe   :  { %353 = vsyncadd [#allocation3], 4294967040  ;;  %vm37_vm0 = vcmask 1043456   ;;  %v29_v0 = vld [vmem:[#allocation2] sm:$0xff]  ;;  %v389_v1 = vld [vmem:[#allocation2 + $0x8] sm:$0xff]  ;;  %v359_v11 = vmov 0.0   ;;  %v53_v12 = vlaneseq }
   0xf   :  { %v33_v2 = vcombine.high %v29_v0, %v29_v0  ;;  %v38_v3 = vsel %vm37_vm0, %v29_v0, 0.0  ;;  %v34_v4 = vcombine.high %v389_v1, %v389_v1  ;;  %v43_v6 = vsel %vm37_vm0, %v389_v1, 0.0  ;;  %v50_v10 = vld [vmem:[%s413_s1] sm:$0xf]  ;;  %289 = vmatprep.subr.mxu0 %v359_v11  ;;  %294 = vmatprep.subr.mxu1 %v359_v11 }
  0x10   :  { %vm360_vm1 = vmmov 0   ;;  %290 = vmatpush3.msk.msra.mxu0 %vm37_vm0, %v50_v10  ;;  %v54_v13 = vand.u32 127, %v53_v12  ;;  %v56_v14 = vshrl.u32 %v53_v12, 7  ;;  %vm63_vm2 = vcmask 1041409   ;;  %v142_v23 = vld [vmem:[%s414_s2] sm:$0x3] }
  0x11   :  { %v39_v5 = vsel %vm37_vm0, %v33_v2, 0.0  ;;  %v44_v7 = vsel %vm37_vm0, %v34_v4, 0.0  ;;  %291 = vmatprep.mubr.msk.f32.mxu0 %vm360_vm1, %v359_v11  ;;  %296 = vmatprep.mubr.msk.f32.mxu1 %vm360_vm1, %v359_v11  ;;  %vm65_vm3 = vcmask 31744   ;;  %vm147_vm4 = vcmask 1041408   ;;  %s362_s2 = smov [#allocation5]  }
  0x12   :  { %v40_v8 = vadd.f32 %v39_v5, %v38_v3  ;;  %v45_v9 = vadd.f32 %v44_v7, %v43_v6  ;;  %v57_v16 = vsub.s32 %v54_v13, %v56_v14  ;;  %295 = vmatpush3.msk.msra.mxu1 %vm147_vm4, %v142_v23  ;;  %vm143_vm5 = vcmask 15360   ;;  %s268_s21 = sshll.u32 %s362_s2, 4  ;;  %s269_s21 = int_to_ptr.vmem [resolvable:$true] %s268_s21 }
  0x13   :  { %v229_v32 = vsub.s32 0, %v56_v14  ;;  %v236_v35 = vsub.s32 1, %v56_v14  ;;  %v361_v37 = vmov 839922192   ;;  %s332_s22 = scalar_lea.vmem %s269_s21, 256  ;;  %p337_p6 = scmp.lt.s32.totalorder %s269_s21, %s269_s21 }
  0x14   :  { %41 = vadd.xlane.f32.xlu0 %v40_v8  ;;  %v244_v38 = vunpack.c.l.s4 %v361_v37  ;;  %p333_p5 = scmp.ne.s32.totalorder %s269_s21, %s332_s22  ;;  %p338_p7 = scmp.lt.s32.totalorder %s332_s22, %s332_s22 }
  0x16   :  { %v245_v39 = vunpack.c.0.s8 %v244_v38  ;;  %p339_p8 = por %p338_p7, %p337_p6 }
  0x18   :  { %46 = vadd.xlane.f32.xlu0 %v45_v9  ;;  %v248_v40 = vsub.s32 %v245_v39, %v56_v14  ;;  %p340_p9 = pnand %p339_p8, %p333_p5 }
  0x9d   :  { %v42_v15 = vpop.xlane.xlu0 %41 }
  0x9e   :  { %v48_v17 = vmul.f32 0.00390625, %v42_v15 }
  0xa0   :  { %v58_v20 = vrot.slane %v48_v17, %v57_v16 }
  0xa1   :  { %v47_v18 = vpop.xlane.xlu0 %46 }
  0xa2   :  { %v49_v19 = vmul.f32 0.00390625, %v47_v18 }
  0xa4   :  { %v62_v21 = vrot.slane %v49_v19, %v57_v16 }
  0xa6   :  { %v64_v22 = vsel %vm63_vm2, %v62_v21, %v58_v20 }
  0xa7   :  { %292 = vmatmul.mubr.msk.f32.vlgmr.msra.gmra.mxu0 %vm65_vm3, %v64_v22 }
 0x167   :  { %v137_v24 = vpop.f32.mrf.mxu0 }
 0x168   :  { %v141_v25 = vmax.f32 %v137_v24, 0.0 }
 0x169   :  { %v293_v26 = vpop.f32.mrf.mxu0 }
 0x16a   :  { %297 = vmatmul.mubr.msk.f32.vlgmr.msra.gmra.mxu1 %vm143_vm5, %v141_v25 }
 0x22a   :  { %v217_v27 = vpop.f32.mrf.mxu1 }
 0x22b   :  { %v284_v28 = vmul.f32 -1.442695, %v217_v27 }
 0x22c   :  { %v298_v29 = vpop.f32.mrf.mxu1 }
 0x22d   :  { %308 = vpow2.f32 %v284_v28 }
 0x23a   :  { %v309_v30 = vpop.eup %308 }
 0x23b   :  { %v224_v31 = vadd.f32 1.0, %v309_v30 }
 0x23d   :  { %310 = vrcp.f32 %v224_v31 }
 0x24a   :  { %v311_v33 = vpop.eup %310 }
 0x24b   :  { %v230_v34 = vrot.slane %v311_v33, %v229_v32  ;;  %v237_v36 = vrot.slane %v311_v33, %v236_v35 }
 0x24d   :  { %232 = vbcast.lane.b32.xlu1 %v230_v34, 256 }
 0x251   :  { %239 = vbcast.lane.b32.xlu1 %v237_v36, 256 }
 0x2bf   :  { %v233_v41 = vpop.permute.xlu1 %232 }
 0x2c0   :  { %v249_v42 = vrot.slane %v233_v41, %v248_v40 }
 0x2c2   :  { %v259_v43 = vmul.f32 %v249_v42, %v29_v0 }
 0x2c3   :  { %v240_v44 = vpop.permute.xlu1 %239 }
 0x2c4   :  { %261 = vst [vmem:[#allocation5] sm:$0xff] %v259_v43  ;;  %v256_v45 = vrot.slane %v240_v44, %v248_v40 }
 0x2c6   :  { %v260_v46 = vmul.f32 %v256_v45, %v389_v1 }
 0x2c8   :  { %262 = vst [vmem:[#allocation5 + $0x8] sm:$0xff] %v260_v46 }
 0x2c9   :  { %343 = shalt.err (!%p340_p9)
}
 0x2ca   :  { %274 = dma.vmem_to_hbm [thread:$0]  %s269_s21, 256, %s415_s3, [#allocation4], %s357_s15, %s357_s15, %s358_s16  }
 0x2cb   :  { %354 = dma.done.wait [#allocation4], 256  }
 0x2cc   :  { %355 = vsyncadd [#allocation4], 4294967040 }
 0x2cd   :  { %278 = vsyncpa [#allocation3], 1 }
 0x2ce   :  { %279 = vsyncpa [#allocation4], 1 }

</bundles_post_ra>
